<compile_context>
chip_gen: v7x
topology: tpu7x:2x2x1
jax: 0.10.0
libtpu: 0.0.40
codegen_flags: <defaults>
</compile_context>

<pallas_src>
import functools

import jax
import jax.numpy as jnp
from jax.experimental import pallas as pl
from jax.experimental.pallas import tpu as pltpu

NEG_SLOPE = 0.01  # nn.LeakyReLU default


def _leaky_relu(x):
    return jnp.where(x >= 0, x, NEG_SLOPE * x)


def _mlp_kernel(x_ref, w1_ref, b1_ref, w2_ref, b2_ref, w3_ref, b3_ref, o_ref):
    # x_ref: (Cin, TL) tile — pixels on the lane axis, channels on sublanes.
    x = x_ref[...]
    # All dots accumulate in f32; bias-add + LeakyReLU stay in f32 (v5e has no
    # bf16 VPU path, and it is free on v6e/v7x); re-cast to the weight dtype
    # only for the next MXU pass.
    h = jnp.dot(w1_ref[...], x, preferred_element_type=jnp.float32) + b1_ref[...]
    h = _leaky_relu(h)
    h = jnp.dot(w2_ref[...], h.astype(w2_ref.dtype),
                preferred_element_type=jnp.float32) + b2_ref[...]
    h = _leaky_relu(h)
    o = jnp.dot(w3_ref[...], h.astype(w3_ref.dtype),
                preferred_element_type=jnp.float32) + b3_ref[...]
    o_ref[...] = o.astype(o_ref.dtype)


def _pick_lane_tile(hw, target):
    """Largest lane tile that (a) divides H*W exactly and (b) is a multiple of
    128, capped at `target`. Falls back to the full row when that is not
    possible (tiny or awkward spatial sizes)."""
    if hw <= target:
        return hw
    if hw % 128 == 0:
        best = None
        t = 128
        while t <= target:
            if hw % t == 0:
                best = t
            t += 128
        if best is not None:
            return best
    return hw


@functools.partial(jax.jit, static_argnames=("lane_tile", "compute_dtype"))
def conv2d1x1_forward(x_nchw, w1, b1, w2, b2, w3, b3, *,
                      lane_tile=2048, compute_dtype=None):
    """x_nchw: (N, Cin, H, W). wk: (Ck_in, Ck_out), bk: (1, Ck_out)."""
    n, cin, hh, ww = x_nchw.shape
    hid = w1.shape[1]
    cout = w3.shape[1]
    hw = hh * ww
    out_dtype = x_nchw.dtype
    cdt = out_dtype if compute_dtype is None else compute_dtype

    # NCHW is already the compute layout: free reshape to (N, Cin, H*W).
    x3 = x_nchw.reshape(n, cin, hw).astype(cdt)

    # Pre-transpose the tiny weights once outside the kernel; biases become
    # (C, 1) columns that broadcast across the lane (pixel) axis in-kernel.
    w1t = w1.T.astype(cdt)                      # (hid, cin)
    w2t = w2.T.astype(cdt)                      # (hid, hid)
    w3t = w3.T.astype(cdt)                      # (cout, hid)
    b1c = b1.reshape(hid, 1).astype(jnp.float32)
    b2c = b2.reshape(hid, 1).astype(jnp.float32)
    b3c = b3.reshape(cout, 1).astype(jnp.float32)

    tl = _pick_lane_tile(hw, lane_tile)
    grid = (n, hw // tl)

    flops = 2 * n * hw * (cin * hid + hid * hid + hid * cout)
    bytes_accessed = (
        x3.size * x3.dtype.itemsize
        + n * cout * hw * jnp.dtype(out_dtype).itemsize
        + sum(int(a.size) * a.dtype.itemsize
              for a in (w1t, w2t, w3t, b1c, b2c, b3c)))

    # NOTE: the weight/bias specs use a constant index_map, so they are loaded
    # once per pipeline stage. At large `hid` on v7x (64 MiB VMEM) consider
    # pipeline_mode=pl.Buffered(1) on them and an explicit vmem_limit_bytes;
    # at the demo's hid=32 their footprint is a few KiB and irrelevant.
    out3 = pl.pallas_call(
        _mlp_kernel,
        out_shape=jax.ShapeDtypeStruct((n, cout, hw), out_dtype),
        grid_spec=pltpu.PrefetchScalarGridSpec(
            num_scalar_prefetch=0,
            grid=grid,
            in_specs=[
                pl.BlockSpec((None, cin, tl), lambda b, j: (b, 0, j)),
                pl.BlockSpec((hid, cin), lambda b, j: (0, 0)),
                pl.BlockSpec((hid, 1), lambda b, j: (0, 0)),
                pl.BlockSpec((hid, hid), lambda b, j: (0, 0)),
                pl.BlockSpec((hid, 1), lambda b, j: (0, 0)),
                pl.BlockSpec((cout, hid), lambda b, j: (0, 0)),
                pl.BlockSpec((cout, 1), lambda b, j: (0, 0)),
            ],
            out_specs=pl.BlockSpec((None, cout, tl), lambda b, j: (b, 0, j)),
        ),
        compiler_params=pltpu.CompilerParams(
            dimension_semantics=("parallel", "parallel")),
        cost_estimate=pl.CostEstimate(
            flops=flops, transcendentals=0, bytes_accessed=bytes_accessed),
    )(x3, w1t, b1c, w2t, b2c, w3t, b3c)

    # (N, Cout, H*W) -> (N, Cout, H, W): free reshape, no transpose.
    return out3.reshape(n, cout, hh, ww)


def init_params(key, in_f, hidden_dim, out_f, dtype=jnp.float32):
    """Deterministic synthetic init. PyTorch conv weight is (out, in, 1, 1);
    we store the equivalent (in, out) matmul matrices."""
    k1, k2, k3, k4, k5, k6 = jax.random.split(key, 6)
    w1 = jax.random.normal(k1, (in_f, hidden_dim), dtype) * 0.1
    b1 = jax.random.normal(k2, (1, hidden_dim), dtype) * 0.1
    w2 = jax.random.normal(k3, (hidden_dim, hidden_dim), dtype) * 0.1
    b2 = jax.random.normal(k4, (1, hidden_dim), dtype) * 0.1
    w3 = jax.random.normal(k5, (hidden_dim, out_f), dtype) * 0.1
    b3 = jax.random.normal(k6, (1, out_f), dtype) * 0.1
    return w1, b1, w2, b2, w3, b3


def reference_forward(x_nchw, w1, b1, w2, b2, w3, b3):
    """Pure-JAX reference of the PyTorch module semantics."""
    x = jnp.transpose(x_nchw, (0, 2, 3, 1))  # NHWC
    h = _leaky_relu(x @ w1 + b1[0])
    h = _leaky_relu(h @ w2 + b2[0])
    o = h @ w3 + b3[0]
    return jnp.transpose(o, (0, 3, 1, 2))


if __name__ == "__main__":
    key = jax.random.PRNGKey(0)
    kx, kp = jax.random.split(key)

    batch, in_f, hidden_dim, out_f, spatial = 2, 4, 32, 8, 16
    x = jax.random.normal(kx, (batch, in_f, spatial, spatial), jnp.float32)
    params = init_params(kp, in_f, hidden_dim, out_f)

    ref = reference_forward(x, *params)

    # f32 path (matches the PyTorch module's default dtype).
    out = jax.block_until_ready(conv2d1x1_forward(x, *params))
    assert out.shape == (batch, out_f, spatial, spatial), out.shape
    assert jnp.allclose(out, ref, atol=1e-5, rtol=1e-5), "f32 mismatch vs reference"

    # bf16 input/weight path (v6e/v7x MXU fast path), f32 accumulation/epilogue.
    out_bf16 = jax.block_until_ready(
        conv2d1x1_forward(x, *params, compute_dtype=jnp.bfloat16))
    assert jnp.allclose(out_bf16, ref, atol=5e-2, rtol=5e-2), "bf16 mismatch vs reference"

    print("KERNEL_OK")
</pallas_src>

<mosaic_0001>
module attributes {stable_mosaic.version = 11 : i64} {
  func.func @_mlp_kernel(%arg0: i32, %arg1: i32, %arg2: memref<1x4x256xf32, #tpu.memory_space<vmem>>, %arg3: memref<32x4xf32, #tpu.memory_space<vmem>>, %arg4: memref<32x1xf32, #tpu.memory_space<vmem>>, %arg5: memref<32x32xf32, #tpu.memory_space<vmem>>, %arg6: memref<32x1xf32, #tpu.memory_space<vmem>>, %arg7: memref<8x32xf32, #tpu.memory_space<vmem>>, %arg8: memref<8x1xf32, #tpu.memory_space<vmem>>, %arg9: memref<1x8x256xf32, #tpu.memory_space<vmem>>) attributes {dimension_semantics = [#tpu.dimension_semantics<parallel>, #tpu.dimension_semantics<parallel>], iteration_bounds = array<i64: 2, 1>, scalar_prefetch = 0 : i64, scratch_operands = 0 : i64, tpu.core_type = #tpu.core_type<tc>, window_params = [{transform_indices = @transform_0, window_bounds = array<i64: 1, 4, 256>}, {pipeline_mode = #tpu.pipeline_mode<synchronous>, transform_indices = @transform_1, window_bounds = array<i64: 32, 4>}, {pipeline_mode = #tpu.pipeline_mode<synchronous>, transform_indices = @transform_2, window_bounds = array<i64: 32, 1>}, {pipeline_mode = #tpu.pipeline_mode<synchronous>, transform_indices = @transform_3, window_bounds = array<i64: 32, 32>}, {pipeline_mode = #tpu.pipeline_mode<synchronous>, transform_indices = @transform_4, window_bounds = array<i64: 32, 1>}, {pipeline_mode = #tpu.pipeline_mode<synchronous>, transform_indices = @transform_5, window_bounds = array<i64: 8, 32>}, {pipeline_mode = #tpu.pipeline_mode<synchronous>, transform_indices = @transform_6, window_bounds = array<i64: 8, 1>}, {transform_indices = @transform_7, window_bounds = array<i64: 1, 8, 256>}]} {
    %c0 = arith.constant 0 : index
    %c0_0 = arith.constant 0 : index
    %c0_1 = arith.constant 0 : index
    %0 = vector.load %arg2[%c0, %c0_0, %c0_1] : memref<1x4x256xf32, #tpu.memory_space<vmem>>, vector<1x4x256xf32>
    %1 = vector.shape_cast %0 : vector<1x4x256xf32> to vector<4x256xf32>
    %c0_2 = arith.constant 0 : index
    %c0_3 = arith.constant 0 : index
    %2 = vector.load %arg3[%c0_2, %c0_3] : memref<32x4xf32, #tpu.memory_space<vmem>>, vector<32x4xf32>
    %cst = arith.constant dense<0.000000e+00> : vector<32x256xf32>
    %3 = tpu.matmul %2, %1, %cst {dimension_numbers = #tpu.dot_dimension_numbers<[1], [0], [0], [1], [0, 0, 1, 1], [], []>} : vector<32x4xf32>, vector<4x256xf32>, vector<32x256xf32> -> vector<32x256xf32>
    %c0_4 = arith.constant 0 : index
    %c0_5 = arith.constant 0 : index
    %4 = vector.load %arg4[%c0_4, %c0_5] : memref<32x1xf32, #tpu.memory_space<vmem>>, vector<32x1xf32>
    %5 = vector.broadcast %4 : vector<32x1xf32> to vector<32x256xf32>
    %6 = arith.addf %3, %5 : vector<32x256xf32>
    %cst_6 = arith.constant 0.000000e+00 : f32
    %7 = vector.broadcast %cst_6 : f32 to vector<32x256xf32>
    %8 = arith.cmpf oge, %6, %7 : vector<32x256xf32>
    %cst_7 = arith.constant 0.00999999977 : f32
    %9 = vector.broadcast %cst_7 : f32 to vector<32x256xf32>
    %10 = arith.mulf %9, %6 : vector<32x256xf32>
    %11 = arith.select %8, %6, %10 : vector<32x256xi1>, vector<32x256xf32>
    %c0_8 = arith.constant 0 : index
    %c0_9 = arith.constant 0 : index
    %12 = vector.load %arg5[%c0_8, %c0_9] : memref<32x32xf32, #tpu.memory_space<vmem>>, vector<32x32xf32>
    %cst_10 = arith.constant dense<0.000000e+00> : vector<32x256xf32>
    %13 = tpu.matmul %12, %11, %cst_10 {dimension_numbers = #tpu.dot_dimension_numbers<[1], [0], [0], [1], [0, 0, 1, 1], [], []>} : vector<32x32xf32>, vector<32x256xf32>, vector<32x256xf32> -> vector<32x256xf32>
    %c0_11 = arith.constant 0 : index
    %c0_12 = arith.constant 0 : index
    %14 = vector.load %arg6[%c0_11, %c0_12] : memref<32x1xf32, #tpu.memory_space<vmem>>, vector<32x1xf32>
    %15 = vector.broadcast %14 : vector<32x1xf32> to vector<32x256xf32>
    %16 = arith.addf %13, %15 : vector<32x256xf32>
    %cst_13 = arith.constant 0.000000e+00 : f32
    %17 = vector.broadcast %cst_13 : f32 to vector<32x256xf32>
    %18 = arith.cmpf oge, %16, %17 : vector<32x256xf32>
    %cst_14 = arith.constant 0.00999999977 : f32
    %19 = vector.broadcast %cst_14 : f32 to vector<32x256xf32>
    %20 = arith.mulf %19, %16 : vector<32x256xf32>
    %21 = arith.select %18, %16, %20 : vector<32x256xi1>, vector<32x256xf32>
    %c0_15 = arith.constant 0 : index
    %c0_16 = arith.constant 0 : index
    %22 = vector.load %arg7[%c0_15, %c0_16] : memref<8x32xf32, #tpu.memory_space<vmem>>, vector<8x32xf32>
    %cst_17 = arith.constant dense<0.000000e+00> : vector<8x256xf32>
    %23 = tpu.matmul %22, %21, %cst_17 {dimension_numbers = #tpu.dot_dimension_numbers<[1], [0], [0], [1], [0, 0, 1, 1], [], []>} : vector<8x32xf32>, vector<32x256xf32>, vector<8x256xf32> -> vector<8x256xf32>
    %c0_18 = arith.constant 0 : index
    %c0_19 = arith.constant 0 : index
    %24 = vector.load %arg8[%c0_18, %c0_19] : memref<8x1xf32, #tpu.memory_space<vmem>>, vector<8x1xf32>
    %25 = vector.broadcast %24 : vector<8x1xf32> to vector<8x256xf32>
    %26 = arith.addf %23, %25 : vector<8x256xf32>
    %c0_20 = arith.constant 0 : index
    %c0_21 = arith.constant 0 : index
    %c0_22 = arith.constant 0 : index
    %27 = vector.load %arg9[%c0_20, %c0_21, %c0_22] : memref<1x8x256xf32, #tpu.memory_space<vmem>>, vector<1x8x256xf32>
    %28 = vector.shape_cast %27 : vector<1x8x256xf32> to vector<8x256xf32>
    %29 = vector.shape_cast %26 : vector<8x256xf32> to vector<1x8x256xf32>
    tpu.vector_store %arg9[%c0_20, %c0_21, %c0_22], %29 {strides = array<i32>} : memref<1x8x256xf32, #tpu.memory_space<vmem>>, vector<1x8x256xf32>,
    return
  }
  func.func @transform_0(%arg0: i32, %arg1: i32) -> (i32, i32, i32) {
    %c0_i32 = arith.constant 0 : i32
    %c0_i32_0 = arith.constant 0 : i32
    return %arg0, %c0_i32, %arg1 : i32, i32, i32
  }
  func.func @transform_1(%arg0: i32, %arg1: i32) -> (i32, i32) {
    %c0_i32 = arith.constant 0 : i32
    %c0_i32_0 = arith.constant 0 : i32
    %c0_i32_1 = arith.constant 0 : i32
    return %c0_i32, %c0_i32_0 : i32, i32
  }
  func.func @transform_2(%arg0: i32, %arg1: i32) -> (i32, i32) {
    %c0_i32 = arith.constant 0 : i32
    %c0_i32_0 = arith.constant 0 : i32
    %c0_i32_1 = arith.constant 0 : i32
    return %c0_i32, %c0_i32_0 : i32, i32
  }
  func.func @transform_3(%arg0: i32, %arg1: i32) -> (i32, i32) {
    %c0_i32 = arith.constant 0 : i32
    %c0_i32_0 = arith.constant 0 : i32
    %c0_i32_1 = arith.constant 0 : i32
    return %c0_i32, %c0_i32_0 : i32, i32
  }
  func.func @transform_4(%arg0: i32, %arg1: i32) -> (i32, i32) {
    %c0_i32 = arith.constant 0 : i32
    %c0_i32_0 = arith.constant 0 : i32
    %c0_i32_1 = arith.constant 0 : i32
    return %c0_i32, %c0_i32_0 : i32, i32
  }
  func.func @transform_5(%arg0: i32, %arg1: i32) -> (i32, i32) {
    %c0_i32 = arith.constant 0 : i32
    %c0_i32_0 = arith.constant 0 : i32
    %c0_i32_1 = arith.constant 0 : i32
    return %c0_i32, %c0_i32_0 : i32, i32
  }
  func.func @transform_6(%arg0: i32, %arg1: i32) -> (i32, i32) {
    %c0_i32 = arith.constant 0 : i32
    %c0_i32_0 = arith.constant 0 : i32
    %c0_i32_1 = arith.constant 0 : i32
    return %c0_i32, %c0_i32_0 : i32, i32
  }
  func.func @transform_7(%arg0: i32, %arg1: i32) -> (i32, i32, i32) {
    %c0_i32 = arith.constant 0 : i32
    %c0_i32_0 = arith.constant 0 : i32
    return %arg0, %c0_i32, %arg1 : i32, i32, i32
  }
}

</mosaic_0001>

<bundles_post_ra>
// kernel: conv2d1x1_forward.1
= control target key start
LH: loop header
LB: loop body
LE: loop exit
PB: predicated region body
PF: predicated region fallthrough
CT: control target
= control target key end

     0   :  { %s939_s24 = smov 0   ;;  %s941_s25 = smov 0   ;;  %s1048_s0 = inlined_call_operand.vmem [shape: f32[2,4,256], index: 0, kind: input, shape index: {}]   ;;  %s1049_s1 = inlined_call_operand.vmem [shape: f32[32,4], index: 1, kind: input, shape index: {}]   ;;  %s1050_s2 = inlined_call_operand.vmem [shape: f32[32,1], index: 2, kind: input, shape index: {}]   ;;  %s1051_s3 = inlined_call_operand.vmem [shape: f32[32,32], index: 3, kind: input, shape index: {}]   ;;  %s1052_s4 = inlined_call_operand.vmem [shape: f32[32,1], index: 4, kind: input, shape index: {}]   ;;  %s1053_s5 = inlined_call_operand.vmem [shape: f32[8,32], index: 5, kind: input, shape index: {}]   ;;  %s1054_s6 = inlined_call_operand.vmem [shape: f32[8,1], index: 6, kind: input, shape index: {}]   ;;  %s1055_s7 = inlined_call_operand.vmem [shape: f32[2,8,256], index: 7, kind: output, shape index: {}]  }
   0x1   :  { %s943_s26 = smov 0  }
   0x2 LB: > { %s29_s27 = sadd.s32 1, %s891_s25  ;;  %p808_p0 = scmp.ge.s32.totalorder %s895_s26, 1  ;;  %s895_s26 = sphi %s943_s26, %s17_s26   ;;  %s891_s25 = sphi %s941_s25, %s1057_s25   ;;  %s887_s24 = sphi %s939_s24, %s1056_s24  }
   0x3   : > { %p31_p1 = scmp.ge.s32.totalorder %s29_s27, 2  ;;  %p258_p2 = scmp.lt.s32.totalorder %s895_s26, 3 }
   0x5   : > { %s1059_s27 = smov (%p31_p1, %s29_s27), 0  ;;  %p259_p3 = pnand %p808_p0, %p258_p2 }
   0x6   : > { %p299_p4 = scmp.lt.s32.totalorder (!%p259_p3), %s887_s24, 1  ;;  %v897_v0 = vmov (!%p259_p3), 0.0   ;;  %v323_v1 = vld [vmem:[%s1050_s2] sm:$0xff] (!%p259_p3)  ;;  %v898_v2 = vmov (!%p259_p3), 0   ;;  %v325_v3 = vld [vmem:[%s1050_s2 + $0x10] sm:$0xff] (!%p259_p3)  ;;  %v324_v4 = vld [vmem:[%s1050_s2 + $0x8] sm:$0xff] (!%p259_p3) }
   0x7   : > { %262 = sbr.rel (%p259_p3) target bundleno = 710 (0x2c6), region = 48  ;;  %431 = vmatprep.mubr.f32.mxu0 (!%p259_p3), %v897_v0  ;;  %585 = vmatprep.mubr.f32.mxu1 (!%p259_p3), %v897_v0  ;;  %v326_v5 = vld [vmem:[%s1050_s2 + $0x18] sm:$0xff] (!%p259_p3)  ;;  %vm362_vm0 = vcmask (!%p259_p3), 1043456   ;;  %v319_v8 = vld [vmem:[%s1049_s1] sm:$0xff] (!%p259_p3)  ;;  %vm349_vm1 = vcmask (!%p259_p3), 31744   ;;  %v485_v10 = vld [vmem:[%s1052_s4 + $0x8] sm:$0xff] (!%p259_p3) }
   0x8   : > { %870 = vset.pattern.permute.xlu0 (!%p259_p3), %v898_v2  ;;  %871 = vset.pattern.permute.xlu1 (!%p259_p3), %v898_v2  ;;  %v484_v9 = vld [vmem:[%s1052_s4] sm:$0xff] (!%p259_p3)  ;;  %v320_v11 = vld [vmem:[%s1049_s1 + $0x8] sm:$0xff] (!%p259_p3)  ;;  %v486_v12 = vld [vmem:[%s1052_s4 + $0x10] sm:$0xff] (!%p259_p3)  ;;  %vm508_vm10 = vcmask (!%p259_p3), 261120  }
   0x9   : > { %329 = vperm.xlu0 (!%p259_p3), %870, %v323_v1   ;;  %339 = vperm.xlu1 (!%p259_p3), %871, %v325_v3   ;;  %v487_v13 = vld [vmem:[%s1052_s4 + $0x18] sm:$0xff] (!%p259_p3)  ;;  %v321_v14 = vld [vmem:[%s1049_s1 + $0x10] sm:$0xff] (!%p259_p3)  ;;  %v635_v15 = vld [vmem:[%s1054_s6] sm:$0xff] (!%p259_p3) }
   0xa   : > { %v322_v16 = vld [vmem:[%s1049_s1 + $0x18] sm:$0xff] (!%p259_p3)  ;;  %v480_v57 = vld [vmem:[%s1051_s3] sm:$0xff] (!%p259_p3)  ;;  %v481_v58 = vld [vmem:[%s1051_s3 + $0x8] sm:$0xff] (!%p259_p3) }
   0xb   : > { %v482_v59 = vld [vmem:[%s1051_s3 + $0x10] sm:$0xff] (!%p259_p3)  ;;  %v483_v60 = vld [vmem:[%s1051_s3 + $0x18] sm:$0xff] (!%p259_p3) }
   0xd   : > { %334 = vperm.xlu0 (!%p259_p3), %870, %v324_v4   ;;  %344 = vperm.xlu1 (!%p259_p3), %871, %v326_v5  }
   0xe   : > { %s1061_s24 = smov (!%p299_p4, %s887_s24), 1 }
   0xf   : > { %s826_s9 = sshll.u32 %s1061_s24, 3  ;;  %s827_s30 = sshll.u32 %s1061_s24, 4 }
  0x10   : > { %s306_s16 = scalar_lea.vmem %s1048_s0, %s826_s9  ;;  %s316_s10 = scalar_lea.vmem %s1055_s7, %s827_s30 }
  0x11   : > { %v318_v6 = vld [vmem:[%s306_s16] sm:$0xff]  ;;  %490 = vperm.xlu0 %870, %v484_v9   ;;  %495 = vperm.xlu1 %871, %v485_v10  }
  0x12   : > { %v348_v7 = vcombine.high %v318_v6, %v318_v6 }
  0x14   : > { %813 = vmatprep.subr.msk.mxu0 %vm362_vm0, %v348_v7 }
  0x15   : > { %814 = vmatpush1.msk.msra.mxu0 %vm362_vm0, %v318_v6  ;;  %500 = vperm.xlu0 %870, %v486_v12  }
  0x16   : > { %815 = vmatmul.mubr.msk.f32.vlgmr.msra.gmra.mrb[0].mxu0 %vm349_vm1, %v319_v8  ;;  %505 = vperm.xlu1 %871, %v487_v13  }
  0x17   : > { %437 = vmatprep.mubr.f32.mxu0 %v897_v0 }
  0x19   : > { %638 = vperm.xlu0 %870, %v635_v15  }
  0x1a   : > { %816 = vmatmul.mubr.msk.f32.gmra.mrb[2].mxu0 %vm349_vm1, %v320_v11 }
  0x1b   : > { %443 = vmatprep.mubr.f32.mxu0 %v897_v0 }
  0x1e   : > { %817 = vmatmul.mubr.msk.f32.gmra.mrb[4].mxu0 %vm349_vm1, %v321_v14 }
  0x1f   : > { %449 = vmatprep.mubr.f32.mxu0 %v897_v0 }
  0x22   : > { %818 = vmatmul.mubr.msk.f32.gmra.mrb[6].mxu0 %vm349_vm1, %v322_v16 }
  0x23   : > { %708 = vmatprep.mubr.f32.mxu0 %v897_v0 }
  0x88   : > { %v330_v17 = vpop.permute.xlu0 %329  ;;  %v340_v27 = vpop.permute.xlu1 %339 }
  0x8c   : > { %v335_v22 = vpop.permute.xlu0 %334  ;;  %v345_v42 = vpop.permute.xlu1 %344 }
  0x90   : > { %v491_v61 = vpop.permute.xlu0 %490  ;;  %v496_v3 = vpop.permute.xlu1 %495 }
  0x94   : > { %v501_v10 = vpop.permute.xlu0 %500 }
  0xe9   : > { %v433_v18 = vpop.f32.mrb[0].mxu0 }
  0xea   : > { %v434_v19 = vadd.f32 %v433_v18, %v330_v17  ;;  %v435_v20 = vpop.f32.mrb[1].mxu0 }
  0xeb   : > { %v436_v21 = vadd.f32 %v435_v20, %v330_v17 }
  0xec   : > { %v464_v24 = vmul.f32 0.01, %v434_v19  ;;  %vm456_vm2 = vcmp.ge.f32.partialorder %v434_v19, 0.0 }
  0xed   : > { %v439_v23 = vpop.f32.mrb[2].mxu0  ;;  %v465_v28 = vmul.f32 0.01, %v436_v21  ;;  %vm457_vm3 = vcmp.ge.f32.partialorder %v436_v21, 0.0 }
  0xee   : > { %v440_v25 = vadd.f32 %v439_v23, %v335_v22  ;;  %v441_v26 = vpop.f32.mrb[3].mxu0  ;;  %v472_v35 = vsel %vm456_vm2, %v434_v19, %v464_v24 }
  0xef   : > { %v442_v29 = vadd.f32 %v441_v26, %v335_v22  ;;  %v473_v38 = vsel %vm457_vm3, %v436_v21, %v465_v28  ;;  %v506_v22 = vpop.permute.xlu1 %505 }
  0xf0   : > { %v466_v30 = vmul.f32 0.01, %v440_v25  ;;  %vm458_vm4 = vcmp.ge.f32.partialorder %v440_v25, 0.0 }
  0xf1   : > { %v467_v31 = vmul.f32 0.01, %v442_v29  ;;  %v445_v32 = vpop.f32.mrb[4].mxu0  ;;  %vm459_vm5 = vcmp.ge.f32.partialorder %v442_v29, 0.0 }
  0xf2   : > { %v446_v33 = vadd.f32 %v445_v32, %v340_v27  ;;  %v447_v34 = vpop.f32.mrb[5].mxu0  ;;  %v474_v36 = vsel %vm458_vm4, %v440_v25, %v466_v30 }
  0xf3   : > { %v448_v37 = vadd.f32 %v447_v34, %v340_v27  ;;  %v475_v39 = vsel %vm459_vm5, %v442_v29, %v467_v31  ;;  %v830_v40 = vpack.c.bf16 %v474_v36, %v472_v35 }
  0xf4   : > { %v828_v41 = vpack.c.bf16 %v475_v39, %v473_v38  ;;  %v468_v44 = vmul.f32 0.01, %v446_v33  ;;  %vm460_vm6 = vcmp.ge.f32.partialorder %v446_v33, 0.0  ;;  %v639_v38 = vpop.permute.xlu0 %638 }
  0xf5   : > { %v451_v43 = vpop.f32.mrb[6].mxu0  ;;  %v469_v47 = vmul.f32 0.01, %v448_v37  ;;  %vm461_vm7 = vcmp.ge.f32.partialorder %v448_v37, 0.0 }
  0xf6   : > { %v452_v45 = vadd.f32 %v451_v43, %v345_v42  ;;  %v453_v46 = vpop.f32.mrb[7].mxu0  ;;  %829 = vmatprep.subr.bf16.mxu1 %v828_v41  ;;  %v476_v51 = vsel %vm460_vm6, %v446_v33, %v468_v44 }
  0xf7   : > { %v454_v48 = vadd.f32 %v453_v46, %v345_v42  ;;  %831 = vmatpush1.bf16.msra.mxu1 %v830_v40  ;;  %v477_v53 = vsel %vm461_vm7, %v448_v37, %v469_v47  ;;  %v634_v37 = vld [vmem:[%s1053_s5] sm:$0xff] }
  0xf8   : > { %vm462_vm8 = vcmp.ge.f32.partialorder %v452_v45, 0.0  ;;  %v470_v49 = vmul.f32 0.01, %v452_v45 }
  0xf9   : > { %vm463_vm9 = vcmp.ge.f32.partialorder %v454_v48, 0.0  ;;  %v471_v50 = vmul.f32 0.01, %v454_v48 }
  0xfa   : > { %v478_v52 = vsel %vm462_vm8, %v452_v45, %v470_v49 }
  0xfb   : > { %v479_v54 = vsel %vm463_vm9, %v454_v48, %v471_v50  ;;  %v834_v55 = vpack.c.bf16 %v478_v52, %v476_v51 }
  0xfc   : > { %v832_v56 = vpack.c.bf16 %v479_v54, %v477_v53 }
  0xfe   : > { %833 = vmatprep.subr.bf16.mxu1 %v832_v56 }
  0xff   : > { %835 = vmatpush1.bf16.msra.mxu1 %v834_v55 }
 0x102   : > { %819 = vmatmul.mubr.msk.f32.vlgmr.msra.gmra.mrb[0].mxu1 %vm508_vm10, %v480_v57 }
 0x103   : > { %591 = vmatprep.mubr.f32.mxu1 %v897_v0 }
 0x106   : > { %820 = vmatmul.mubr.msk.f32.gmra.mrb[2].mxu1 %vm508_vm10, %v481_v58 }
 0x107   : > { %597 = vmatprep.mubr.f32.mxu1 %v897_v0 }
 0x10a   : > { %821 = vmatmul.mubr.msk.f32.gmra.mrb[4].mxu1 %vm508_vm10, %v482_v59 }
 0x10b   : > { %603 = vmatprep.mubr.f32.mxu1 %v897_v0 }
 0x10e   : > { %822 = vmatmul.mubr.msk.f32.gmra.mrb[6].mxu1 %vm508_vm10, %v483_v60 }
 0x1d5   : > { %v587_v62 = vpop.f32.mrb[0].mxu1 }
 0x1d6   : > { %v588_v63 = vadd.f32 %v587_v62, %v491_v61  ;;  %v589_v1 = vpop.f32.mrb[1].mxu1 }
 0x1d7   : > { %v590_v2 = vadd.f32 %v589_v1, %v491_v61 }
 0x1d8   : > { %v618_v5 = vmul.f32 0.01, %v588_v63  ;;  %vm610_vm11 = vcmp.ge.f32.partialorder %v588_v63, 0.0 }
 0x1d9   : > { %v593_v4 = vpop.f32.mrb[2].mxu1  ;;  %v619_v8 = vmul.f32 0.01, %v590_v2  ;;  %vm611_vm12 = vcmp.ge.f32.partialorder %v590_v2, 0.0 }
 0x1da   : > { %v594_v6 = vadd.f32 %v593_v4, %v496_v3  ;;  %v595_v7 = vpop.f32.mrb[3].mxu1  ;;  %v626_v13 = vsel %vm610_vm11, %v588_v63, %v618_v5 }
 0x1db   : > { %v596_v9 = vadd.f32 %v595_v7, %v496_v3  ;;  %v627_v19 = vsel %vm611_vm12, %v590_v2, %v619_v8 }
 0x1dc   : > { %vm612_vm13 = vcmp.ge.f32.partialorder %v594_v6, 0.0  ;;  %v620_v0 = vmul.f32 0.01, %v594_v6 }
 0x1dd   : > { %vm613_vm14 = vcmp.ge.f32.partialorder %v596_v9, 0.0  ;;  %v621_v11 = vmul.f32 0.01, %v596_v9  ;;  %v599_v12 = vpop.f32.mrb[4].mxu1 }
 0x1de   : > { %v628_v14 = vsel %vm612_vm13, %v594_v6, %v620_v0  ;;  %v600_v15 = vadd.f32 %v599_v12, %v501_v10  ;;  %v601_v16 = vpop.f32.mrb[5].mxu1 }
 0x1df   : > { %v838_v17 = vpack.c.bf16 %v628_v14, %v626_v13  ;;  %v602_v18 = vadd.f32 %v601_v16, %v501_v10  ;;  %v629_v20 = vsel %vm613_vm14, %v596_v9, %v621_v11 }
 0x1e0   : > { %v836_v21 = vpack.c.bf16 %v629_v20, %v627_v19  ;;  %v622_v24 = vmul.f32 0.01, %v600_v15  ;;  %vm614_vm15 = vcmp.ge.f32.partialorder %v600_v15, 0.0 }
 0x1e1   : > { %v605_v23 = vpop.f32.mrb[6].mxu1  ;;  %v623_v27 = vmul.f32 0.01, %v602_v18  ;;  %vm615_vm0 = vcmp.ge.f32.partialorder %v602_v18, 0.0 }
 0x1e2   : > { %v606_v25 = vadd.f32 %v605_v23, %v506_v22  ;;  %v607_v26 = vpop.f32.mrb[7].mxu1  ;;  %837 = vmatprep.subr.bf16.mxu0 %v836_v21  ;;  %v630_v31 = vsel %vm614_vm15, %v600_v15, %v622_v24 }
 0x1e3   : > { %v608_v28 = vadd.f32 %v607_v26, %v506_v22  ;;  %839 = vmatpush1.bf16.msra.mxu0 %v838_v17  ;;  %v631_v34 = vsel %vm615_vm0, %v602_v18, %v623_v27 }
 0x1e4   : > { %vm616_vm1 = vcmp.ge.f32.partialorder %v606_v25, 0.0  ;;  %v624_v29 = vmul.f32 0.01, %v606_v25 }
 0x1e5   : > { %vm617_vm2 = vcmp.ge.f32.partialorder %v608_v28, 0.0  ;;  %v625_v30 = vmul.f32 0.01, %v608_v28 }
 0x1e6   : > { %v632_v32 = vsel %vm616_vm1, %v606_v25, %v624_v29 }
 0x1e7   : > { %v842_v33 = vpack.c.bf16 %v632_v32, %v630_v31  ;;  %v633_v35 = vsel %vm617_vm2, %v608_v28, %v625_v30 }
 0x1e8   : > { %v840_v36 = vpack.c.bf16 %v633_v35, %v631_v34 }
 0x1ea   : > { %841 = vmatprep.subr.bf16.mxu0 %v840_v36 }
 0x1eb   : > { %843 = vmatpush1.bf16.msra.mxu0 %v842_v33 }
 0x1ee   : > { %823 = vmatmul.mubr.msk.f32.vlgmr.msra.gmra.mrb[8].mxu0 %vm508_vm10, %v634_v37 }
 0x2c1   : > { %v710_v39 = vpop.f32.mrb[8].mxu0 }
 0x2c2   : > { %v711_v40 = vadd.f32 %v710_v39, %v639_v38  ;;  %v712_v41 = vpop.f32.mrb[9].mxu0 }
 0x2c3   : > { %v713_v42 = vadd.f32 %v712_v41, %v639_v38 }
 0x2c4   : > { %715 = vst [vmem:[%s316_s10] sm:$0xff] %v711_v40 }
 0x2c5   : > { %716 = vst [vmem:[%s316_s10 + $0x8] sm:$0xff] %v713_v42 }
 0x2c6 PF: > { %s17_s26 = sadd.s32 1, %s895_s26   ;;  %s1056_s24 = smov %s891_s25 }
 0x2c7   : > { %p14_p5 = scmp.ge.s32.totalorder %s17_s26, 4   ;;  %s1057_s25 = smov %s1059_s27 }
 0x2c9   :  { %16 = sbr.rel (!%p14_p5) target bundleno = 2 (0x2), region = 78 }

</bundles_post_ra>
